<compile_context>
chip_gen: v7x
topology: tpu7x:2x2x1
jax: 0.10.0
libtpu: 0.0.40
codegen_flags: <defaults>
</compile_context>

<pallas_src>
import jax
import jax.numpy as jnp
from jax.experimental import pallas as pl
from jax.experimental.pallas import tpu as pltpu


_MAX_DMA_CHUNKS = 8
_LANE_CANDIDATES = (4096, 2048, 1024, 512, 256, 128)


def _chunk_bounds(rows: int, max_chunks: int):
    """Static (start, size) chunks along axis 0, as even as possible."""
    n_chunks = max(1, min(max_chunks, rows))
    base = rows // n_chunks
    rem = rows % n_chunks
    bounds = []
    start = 0
    for i in range(n_chunks):
        size = base + (1 if i < rem else 0)
        bounds.append((start, size))
        start += size
    return bounds


def _make_dma_identity_kernel(bounds):
    """Kernel body: pure HBM->HBM async-DMA copy (no VMEM staging, no grid)."""

    def kernel(x_ref, o_ref, sems):
        # Start every chunk copy first (multiple DMAs in flight), then wait.
        for idx, (start, size) in enumerate(bounds):
            pltpu.make_async_copy(
                x_ref.at[pl.ds(start, size)],
                o_ref.at[pl.ds(start, size)],
                sems.at[idx],
            ).start()
        for idx, (start, size) in enumerate(bounds):
            pltpu.make_async_copy(
                x_ref.at[pl.ds(start, size)],
                o_ref.at[pl.ds(start, size)],
                sems.at[idx],
            ).wait()

    return kernel


def _identity_copy_pallas(x: jax.Array) -> jax.Array:
    orig_shape = x.shape
    n = x.size

    # 2-D slab purely so the copy can be chunked along rows; the DMA engines
    # do not care about lane/sublane layout for an HBM->HBM copy, so the
    # non-128-multiple fallback (1, n) is perfectly fine here.
    lane = next((c for c in _LANE_CANDIDATES if n % c == 0), None)
    x2 = x.reshape(n // lane, lane) if lane is not None else x.reshape(1, n)
    rows, cols = x2.shape

    bounds = _chunk_bounds(rows, _MAX_DMA_CHUNKS)
    kernel = _make_dma_identity_kernel(bounds)

    y2 = pl.pallas_call(
        kernel,
        out_shape=jax.ShapeDtypeStruct((rows, cols), x.dtype),
        in_specs=[pl.BlockSpec(memory_space=pl.ANY)],
        out_specs=pl.BlockSpec(memory_space=pl.ANY),
        scratch_shapes=[pltpu.SemaphoreType.DMA((len(bounds),))],
    )(x2)

    return y2.reshape(orig_shape)


def linear_activation(x: jax.Array, *, force_pallas: bool = False) -> jax.Array:
    """Pallas implementation of LinearActivation.forward (identity).

    Default path returns x without launching any kernel (fastest possible).
    Set force_pallas=True to materialize a fresh output buffer via a raw
    HBM->HBM DMA copy kernel.
    """
    if not force_pallas or x.size == 0:
        return x
    if x.ndim == 0:
        return _identity_copy_pallas(x.reshape(1, 1)).reshape(())
    return _identity_copy_pallas(x)


if __name__ == "__main__":
    key = jax.random.PRNGKey(0)
    k0, k1, k2 = jax.random.split(key, 3)

    # Small shape consistent with an activation in the SIREN autoencoder.
    x = jax.random.normal(k0, (2, 4, 16, 16), dtype=jnp.float32)
    y = jax.block_until_ready(linear_activation(x, force_pallas=True))
    assert y.shape == x.shape and y.dtype == x.dtype
    assert bool(jnp.array_equal(y, x))

    # bf16 hidden activation (batch=8, hidden=48): dtype + 128-lane slab path.
    xb = jax.random.normal(k1, (8, 48), dtype=jnp.bfloat16)
    yb = jax.block_until_ready(linear_activation(xb, force_pallas=True))
    assert yb.shape == xb.shape and yb.dtype == xb.dtype
    assert bool(jnp.array_equal(yb, xb))

    # Odd element count: exercises the non-128-multiple fallback (single DMA).
    xo = jax.random.normal(k2, (3, 33), dtype=jnp.float32)
    yo = jax.block_until_ready(linear_activation(xo, force_pallas=True))
    assert yo.shape == xo.shape and yo.dtype == xo.dtype
    assert bool(jnp.array_equal(yo, xo))

    # Default path: identity short-circuit (no kernel launch at all).
    z = linear_activation(x)
    assert z is x

    print("KERNEL_OK")
</pallas_src>

<mosaic_0001>
module attributes {stable_mosaic.version = 11 : i64} {
  func.func @kernel(%arg0: memref<1x2048xf32, #tpu.memory_space<any>>, %arg1: memref<1x2048xf32, #tpu.memory_space<any>>, %arg2: memref<1x!tpu.dma_semaphore, #tpu.memory_space<semaphore_mem>>) attributes {dimension_semantics = [], scalar_prefetch = 0 : i64, scratch_operands = 1 : i64, tpu.core_type = #tpu.core_type<tc>} {
    %c0_i32 = arith.constant 0 : i32
    %c0_i32_0 = arith.constant 0 : i32
    %c0_i32_1 = arith.constant 0 : i32
    %0 = tpu.memref_slice %arg0[%c0_i32_0, %c0_i32_1] : memref<1x2048xf32, #tpu.memory_space<any>> -> memref<1x2048xf32, #tpu.memory_space<any>>
    %c0_i32_2 = arith.constant 0 : i32
    %c0_i32_3 = arith.constant 0 : i32
    %1 = tpu.memref_slice %arg1[%c0_i32_2, %c0_i32_3] : memref<1x2048xf32, #tpu.memory_space<any>> -> memref<1x2048xf32, #tpu.memory_space<any>>
    %2 = tpu.memref_slice %arg2[%c0_i32] : memref<1x!tpu.dma_semaphore, #tpu.memory_space<semaphore_mem>> -> memref<1x!tpu.dma_semaphore, #tpu.memory_space<semaphore_mem>>
    %3 = tpu.memref_squeeze %2 : memref<1x!tpu.dma_semaphore, #tpu.memory_space<semaphore_mem>> -> memref<!tpu.dma_semaphore, #tpu.memory_space<semaphore_mem>>
    tpu.enqueue_dma source(%0 : memref<1x2048xf32, #tpu.memory_space<any>>) target(%1 : memref<1x2048xf32, #tpu.memory_space<any>>) target_semaphore(%3 : memref<!tpu.dma_semaphore, #tpu.memory_space<semaphore_mem>>)
    %c0_i32_4 = arith.constant 0 : i32
    %c0_i32_5 = arith.constant 0 : i32
    %c0_i32_6 = arith.constant 0 : i32
    %4 = tpu.memref_slice %arg0[%c0_i32_5, %c0_i32_6] : memref<1x2048xf32, #tpu.memory_space<any>> -> memref<1x2048xf32, #tpu.memory_space<any>>
    %c0_i32_7 = arith.constant 0 : i32
    %c0_i32_8 = arith.constant 0 : i32
    %5 = tpu.memref_slice %arg1[%c0_i32_7, %c0_i32_8] : memref<1x2048xf32, #tpu.memory_space<any>> -> memref<1x2048xf32, #tpu.memory_space<any>>
    %6 = tpu.memref_slice %arg2[%c0_i32_4] : memref<1x!tpu.dma_semaphore, #tpu.memory_space<semaphore_mem>> -> memref<1x!tpu.dma_semaphore, #tpu.memory_space<semaphore_mem>>
    %7 = tpu.memref_squeeze %6 : memref<1x!tpu.dma_semaphore, #tpu.memory_space<semaphore_mem>> -> memref<!tpu.dma_semaphore, #tpu.memory_space<semaphore_mem>>
    tpu.wait_dma2 semaphore(%7 : memref<!tpu.dma_semaphore, #tpu.memory_space<semaphore_mem>>) src(%4 : memref<1x2048xf32, #tpu.memory_space<any>>) dst(%5 : memref<1x2048xf32, #tpu.memory_space<any>>)
    return
  }
}

</mosaic_0001>

<bundles_post_ra>
// kernel: tpu_custom_call.1
= control target key start
LH: loop header
LB: loop body
LE: loop exit
PB: predicated region body
PF: predicated region fallthrough
CT: control target
= control target key end

     0   :  { %s34_s6 = smov [#allocation2]   ;;  %s35_s7 = smov [#allocation3]   ;;  %s53_s0 = inlined_call_operand.hbm [shape: f32[1,2048], index: 0, kind: input, shape index: {}]   ;;  %s54_s1 = inlined_call_operand.hbm [shape: f32[1,2048], index: 1, kind: output, shape index: {}]  }
   0x1   :  { %s36_s8 = smov 0  }
   0x2   :  { %18 = dma.general %s53_s0, 256, %s54_s1, %s34_s6, %s35_s7, [#allocation4], %s36_s8, 0  }
   0x3   :  { %32 = dma.done.wait [#allocation2], 256 }
   0x4   :  { %33 = vsyncadd [#allocation2], 4294967040 }
   0x5   :  { %22 = vsyncmov [#allocation2] }
   0x8   :  { %s23_s13 = vpop.sfrf %22 }
   0x9   :  { %p28_p0 = scmp.ne.s32.totalorder %s23_s13, 0 }
   0xb   :  { %27 = shalt.err (%p28_p0)  }

</bundles_post_ra>
